<compile_context>
chip_gen: v7x
topology: tpu7x:2x2x1
jax: 0.10.0
libtpu: 0.0.40
codegen_flags: <defaults>
</compile_context>

<pallas_src>
import jax
import jax.numpy as jnp
from jax import lax
from jax.experimental import pallas as pl
from jax.experimental.pallas import tpu as pltpu


def _round_up(x, m):
    return ((x + m - 1) // m) * m


def hebbian_rc_fwd_kernel(x_ref, w_ref, o_ref):
    # x_ref: (TILE_B, K) flattened images
    # w_ref: (C_out, K)  flattened conv weights (natural layout, resident)
    # o_ref: (TILE_B, C_out)
    y = lax.dot_general(
        x_ref[...], w_ref[...],
        dimension_numbers=(((1,), (1,)), ((), ())),
        preferred_element_type=jnp.float32,
    )  # (TILE_B, C_out)

    c_out = y.shape[-1]
    # detach_norm: divide each sample by RMS over (C, H, W) == over C_out here.
    ms = jnp.sum(y * y, axis=-1, keepdims=True) * (1.0 / c_out)   # (TILE_B, 1)
    inv = 1.0 / (jnp.sqrt(ms) + 1e-8)                              # exact
    o_ref[...] = y * inv


def method_hebbian_rc_forward(data, weight, tile_b=1024):
    """data: (B, 1, 28, 28) float32 NCHW; weight: (C_out, 1, 28, 28) float32.
    Returns z: (B, C_out, 1, 1) float32."""
    B = data.shape[0]
    C_out = weight.shape[0]
    K = weight.shape[1] * weight.shape[2] * weight.shape[3]   # 1*28*28 = 784

    x_flat = data.reshape(B, K).astype(jnp.float32)           # (B, 784)
    w_flat = weight.reshape(C_out, K).astype(jnp.float32)     # (16, 784)

    # Batch tile: multiple of 8 sublanes, capped at tile_b, padded batch.
    tb = max(8, min(tile_b, _round_up(B, 8)))
    B_pad = _round_up(B, tb)
    if B_pad != B:
        # Zero-padded rows normalize independently per-row (y=0 -> z=0),
        # and are sliced away below, so valid rows are unaffected.
        x_flat = jnp.pad(x_flat, ((0, B_pad - B), (0, 0)))

    out = pl.pallas_call(
        hebbian_rc_fwd_kernel,
        out_shape=jax.ShapeDtypeStruct((B_pad, C_out), jnp.float32),
        grid_spec=pltpu.PrefetchScalarGridSpec(
            num_scalar_prefetch=0,
            grid=(B_pad // tb,),
            in_specs=[
                pl.BlockSpec((tb, K), lambda i: (i, 0)),       # streamed x tiles
                pl.BlockSpec((C_out, K), lambda i: (0, 0)),    # weight stays resident
            ],
            out_specs=pl.BlockSpec((tb, C_out), lambda i: (i, 0)),
        ),
        compiler_params=pltpu.CompilerParams(
            dimension_semantics=("parallel",),                 # megacore batch split
        ),
    )(x_flat, w_flat)

    return out[:B].reshape(B, C_out, 1, 1)


def _reference_forward(data, weight):
    # Pure-JAX reference for sanity checking.
    B = data.shape[0]
    C_out = weight.shape[0]
    x = data.reshape(B, -1)
    w = weight.reshape(C_out, -1)
    y = x @ w.T
    ms = jnp.mean(y * y, axis=-1, keepdims=True)
    z = y / (jnp.sqrt(ms) + 1e-8)
    return z.reshape(B, C_out, 1, 1)


if __name__ == "__main__":
    key = jax.random.PRNGKey(0)
    k_data, k_w, k_data2 = jax.random.split(key, 3)

    # Deterministic init of the HebbianLearning conv weight:
    # (out_size=16, in_channels=1, kernel=28x28), small-scale normal init.
    weight = 0.05 * jax.random.normal(k_w, (16, 1, 28, 28), dtype=jnp.float32)

    # Case 1: batch a multiple of the sublane tile.
    B1 = 8
    data1 = jax.random.normal(k_data, (B1, 1, 28, 28), dtype=jnp.float32)
    z1 = jax.block_until_ready(method_hebbian_rc_forward(data1, weight))
    z1_ref = _reference_forward(data1, weight)
    assert z1.shape == (B1, 16, 1, 1)
    assert jnp.allclose(z1, z1_ref, atol=1e-4, rtol=1e-4), (
        float(jnp.max(jnp.abs(z1 - z1_ref))))

    # Case 2: batch NOT a multiple of 8 (exercises the padding + slice path).
    B2 = 12
    data2 = jax.random.normal(k_data2, (B2, 1, 28, 28), dtype=jnp.float32)
    z2 = jax.block_until_ready(method_hebbian_rc_forward(data2, weight))
    z2_ref = _reference_forward(data2, weight)
    assert z2.shape == (B2, 16, 1, 1)
    assert jnp.allclose(z2, z2_ref, atol=1e-4, rtol=1e-4), (
        float(jnp.max(jnp.abs(z2 - z2_ref))))

    print("KERNEL_OK")
</pallas_src>

<mosaic_0001>
module attributes {stable_mosaic.version = 11 : i64} {
  func.func @hebbian_rc_fwd_kernel(%arg0: i32, %arg1: memref<8x784xf32, #tpu.memory_space<vmem>>, %arg2: memref<16x784xf32, #tpu.memory_space<vmem>>, %arg3: memref<8x16xf32, #tpu.memory_space<vmem>>) attributes {dimension_semantics = [#tpu.dimension_semantics<parallel>], iteration_bounds = array<i64: 1>, scalar_prefetch = 0 : i64, scratch_operands = 0 : i64, tpu.core_type = #tpu.core_type<tc>, window_params = [{transform_indices = @transform_0, window_bounds = array<i64: 8, 784>}, {pipeline_mode = #tpu.pipeline_mode<synchronous>, transform_indices = @transform_1, window_bounds = array<i64: 16, 784>}, {transform_indices = @transform_2, window_bounds = array<i64: 8, 16>}]} {
    %c0 = arith.constant 0 : index
    %c0_0 = arith.constant 0 : index
    %0 = vector.load %arg1[%c0, %c0_0] : memref<8x784xf32, #tpu.memory_space<vmem>>, vector<8x784xf32>
    %c0_1 = arith.constant 0 : index
    %c0_2 = arith.constant 0 : index
    %1 = vector.load %arg2[%c0_1, %c0_2] : memref<16x784xf32, #tpu.memory_space<vmem>>, vector<16x784xf32>
    %cst = arith.constant dense<0.000000e+00> : vector<8x16xf32>
    %2 = tpu.matmul %0, %1, %cst {dimension_numbers = #tpu.dot_dimension_numbers<[1], [1], [0], [0], [0, 0, 1, 0], [], []>} : vector<8x784xf32>, vector<16x784xf32>, vector<8x16xf32> -> vector<8x16xf32>
    %3 = arith.mulf %2, %2 : vector<8x16xf32>
    %cst_3 = arith.constant dense<0.000000e+00> : vector<8xf32>
    %4 = vector.multi_reduction <add>, %3, %cst_3 [1] : vector<8x16xf32> to vector<8xf32>
    %5 = vector.shape_cast %4 : vector<8xf32> to vector<8x1xf32>
    %cst_4 = arith.constant 6.250000e-02 : f32
    %6 = vector.broadcast %cst_4 : f32 to vector<8x1xf32>
    %7 = arith.mulf %5, %6 : vector<8x1xf32>
    %8 = math.sqrt %7 : vector<8x1xf32>
    %cst_5 = arith.constant 9.99999993E-9 : f32
    %9 = vector.broadcast %cst_5 : f32 to vector<8x1xf32>
    %10 = arith.addf %8, %9 : vector<8x1xf32>
    %cst_6 = arith.constant 1.000000e+00 : f32
    %11 = vector.broadcast %cst_6 : f32 to vector<8x1xf32>
    %12 = arith.divf %11, %10 : vector<8x1xf32>
    %13 = vector.broadcast %12 : vector<8x1xf32> to vector<8x16xf32>
    %14 = arith.mulf %2, %13 : vector<8x16xf32>
    %c0_7 = arith.constant 0 : index
    %c0_8 = arith.constant 0 : index
    %15 = vector.load %arg3[%c0_7, %c0_8] : memref<8x16xf32, #tpu.memory_space<vmem>>, vector<8x16xf32>
    tpu.vector_store %arg3[%c0_7, %c0_8], %14 {strides = array<i32>} : memref<8x16xf32, #tpu.memory_space<vmem>>, vector<8x16xf32>,
    return
  }
  func.func @transform_0(%arg0: i32) -> (i32, i32) {
    %c0_i32 = arith.constant 0 : i32
    %c0_i32_0 = arith.constant 0 : i32
    return %arg0, %c0_i32 : i32, i32
  }
  func.func @transform_1(%arg0: i32) -> (i32, i32) {
    %c0_i32 = arith.constant 0 : i32
    %c0_i32_0 = arith.constant 0 : i32
    %c0_i32_1 = arith.constant 0 : i32
    return %c0_i32, %c0_i32_0 : i32, i32
  }
  func.func @transform_2(%arg0: i32) -> (i32, i32) {
    %c0_i32 = arith.constant 0 : i32
    %c0_i32_0 = arith.constant 0 : i32
    return %arg0, %c0_i32 : i32, i32
  }
}

</mosaic_0001>

<bundles_post_ra>
// kernel: tpu_custom_call.1
= control target key start
LH: loop header
LB: loop body
LE: loop exit
PB: predicated region body
PF: predicated region fallthrough
CT: control target
= control target key end

     0   :  { %7 = vsyncpa [#allocation3], 0  ;;  %s571_s0 = inlined_call_operand.hbm [shape: f32[8,784], index: 0, kind: input, shape index: {}]   ;;  %s572_s1 = inlined_call_operand.hbm [shape: f32[16,784], index: 1, kind: input, shape index: {}]   ;;  %s573_s2 = inlined_call_operand.hbm [shape: f32[8,16], index: 2, kind: output, shape index: {}]  }
   0x1   :  { %8 = vsyncpa [#allocation6], 0 }
   0x2   :  { %9 = vsyncpa [#allocation4], 0  ;;  %s500_s9 = smov [#allocation2]   ;;  %s501_s11 = smov [#allocation5]  }
   0x3   :  { %s16_s10 = sshll.u32 %s500_s9, 4  ;;  %s25_s12 = sshll.u32 %s501_s11, 4  ;;  %s17_s10 = int_to_ptr.vmem [resolvable:$true] %s16_s10  ;;  %s523_s12 = int_to_ptr.vmem [resolvable:$true] %s25_s12 }
   0x4   :  { %s428_s15 = scalar_lea.hbm %s571_s0, 896 }
   0x5   :  { %p429_p0 = scmp.ne.s32.totalorder %s571_s0, %s428_s15  ;;  %p432_p1 = scmp.lt.u32.totalorder %s428_s15, %s571_s0 }
   0x7   :  { %p434_p2 = pnand %p432_p1, %p429_p0 }
   0x9   :  { %437 = shalt.err (!%p434_p2)
}
   0xa   :  { %s438_s20 = scalar_lea.vmem %s17_s10, 896  ;;  %p443_p4 = scmp.lt.s32.totalorder %s17_s10, %s17_s10 }
   0xb   :  { %p439_p3 = scmp.ne.s32.totalorder %s17_s10, %s438_s20  ;;  %p444_p5 = scmp.lt.s32.totalorder %s438_s20, %s438_s20 }
   0xd   :  { %p445_p6 = por %p444_p5, %p443_p4 }
   0xf   :  { %p446_p7 = pnand %p445_p6, %p439_p3 }
  0x11   :  { %449 = shalt.err (!%p446_p7)
}
  0x12   :  { %19 = dma.hbm_to_vmem [thread:$0]  %s571_s0, 896, %s17_s10, [#allocation3]  }
  0x13   :  { %s450_s25 = scalar_lea.hbm %s572_s1, 1792 }
  0x14   :  { %p451_p8 = scmp.ne.s32.totalorder %s572_s1, %s450_s25  ;;  %p454_p9 = scmp.lt.u32.totalorder %s450_s25, %s572_s1 }
  0x16   :  { %p456_p10 = pnand %p454_p9, %p451_p8 }
  0x18   :  { %459 = shalt.err (!%p456_p10)
}
  0x19   :  { %s460_s30 = scalar_lea.vmem %s523_s12, 1792  ;;  %p465_p12 = scmp.lt.s32.totalorder %s523_s12, %s523_s12 }
  0x1a   :  { %p461_p11 = scmp.ne.s32.totalorder %s523_s12, %s460_s30  ;;  %p466_p13 = scmp.lt.s32.totalorder %s460_s30, %s460_s30 }
  0x1c   :  { %p467_p0 = por %p466_p13, %p465_p12 }
  0x1e   :  { %p468_p1 = pnand %p467_p0, %p461_p11 }
  0x20   :  { %471 = shalt.err (!%p468_p1)
}
  0x21   :  { %s502_s0 = smov 896   ;;  %s503_s3 = smov 56  }
  0x22   :  { %31 = dma.hbm_to_vmem [thread:$0]  %s572_s1, 1792, %s523_s12, [#allocation6], %s502_s0, %s502_s0, %s503_s3  }
  0x23   :  { %494 = dma.done.wait [#allocation3], 896  }
  0x24   :  { %495 = vsyncadd [#allocation3], 4294966400 }
  0x25   :  { %496 = dma.done.wait [#allocation6], 1792  }
  0x26   :  { %497 = vsyncadd [#allocation6], 4294965504  ;;  %v46_v0 = vld [vmem:[#allocation5 + $0x8] sm:$0xff]  ;;  %v53_v1 = vld [vmem:[#allocation5 + $0x40] sm:$0xff]  ;;  %v504_v19 = vmov 0.0|0.0   ;;  %vm59_vm0 = vcmask 130048  }
  0x27   :  { %v50_v2 = vld [vmem:[#allocation5 + $0x28] sm:$0xff]  ;;  %v395_v3 = vpack.c.bf16 %v53_v1, %v46_v0  ;;  %v57_v4 = vld [vmem:[#allocation5 + $0x60] sm:$0xff]  ;;  %v52_v6 = vld [vmem:[#allocation5 + $0x38] sm:$0xff]  ;;  %vm505_vm2 = vmmov 0   ;;  %v506_v27 = vmov 0.0   ;;  %s507_s1 = smov [#allocation7]  }
  0x28   :  { %v45_v5 = vld [vmem:[#allocation5] sm:$0xff]  ;;  %v403_v7 = vpack.c.bf16 %v57_v4, %v50_v2  ;;  %v56_v10 = vld [vmem:[#allocation5 + $0x58] sm:$0xff]  ;;  %v39_v11 = vld [vmem:[#allocation2 + $0x8] sm:$0xff]  ;;  %s372_s6 = sshll.u32 %s507_s1, 4  ;;  %s373_s6 = int_to_ptr.vmem [resolvable:$true] %s372_s6 }
  0x29   :  { %v397_v8 = vpack.c.bf16 %v52_v6, %v45_v5  ;;  %v49_v9 = vld [vmem:[#allocation5 + $0x20] sm:$0xff]  ;;  %396 = vmatprep.subr.bf16.mxu1 %v395_v3  ;;  %133 = vmatprep.mubr.f32.mxu1 %v39_v11  ;;  %v43_v13 = vld [vmem:[#allocation2 + $0x28] sm:$0xff]  ;;  %v48_v14 = vld [vmem:[#allocation5 + $0x18] sm:$0xff]  ;;  %s472_s7 = scalar_lea.vmem %s373_s6, 128  ;;  %p477_p3 = scmp.lt.s32.totalorder %s373_s6, %s373_s6 }
  0x2a   :  { %v405_v12 = vpack.c.bf16 %v56_v10, %v49_v9  ;;  %404 = vmatprep.subr.bf16.mxu0 %v403_v7  ;;  %v55_v15 = vld [vmem:[#allocation5 + $0x50] sm:$0xff]  ;;  %273 = vmatprep.mubr.f32.mxu0 %v43_v13  ;;  %v54_v18 = vld [vmem:[#allocation5 + $0x48] sm:$0xff]  ;;  %vm409_vm1 = vmpackc.low %vm59_vm0, %vm59_vm0  ;;  %p473_p2 = scmp.ne.s32.totalorder %s373_s6, %s472_s7  ;;  %p478_p4 = scmp.lt.s32.totalorder %s472_s7, %s472_s7 }
  0x2b   :  { %398 = vmatpush1.bf16.xpose.msra.mxu1 %v397_v8  ;;  %v399_v16 = vpack.c.bf16 %v55_v15, %v48_v14  ;;  %v47_v17 = vld [vmem:[#allocation5 + $0x10] sm:$0xff]  ;;  %v58_v21 = vld [vmem:[#allocation5 + $0x68] sm:$0xff]  ;;  %v41_v26 = vld [vmem:[#allocation2 + $0x18] sm:$0xff] }
  0x2c   :  { %406 = vmatpush1.bf16.xpose.msra.mxu0 %v405_v12  ;;  %v51_v20 = vld [vmem:[#allocation5 + $0x30] sm:$0xff]  ;;  %v38_v22 = vld [vmem:[#allocation2] sm:$0xff]  ;;  %v401_v23 = vpack.c.bf16 %v54_v18, %v47_v17  ;;  %v40_v28 = vld [vmem:[#allocation2 + $0x10] sm:$0xff]  ;;  %p479_p5 = por %p478_p4, %p477_p3 }
  0x2d   :  { %407 = vmatprep.subr.bf16.mxu0 %v504_v19  ;;  %400 = vmatprep.subr.bf16.mxu1 %v399_v16  ;;  %v42_v24 = vld [vmem:[#allocation2 + $0x20] sm:$0xff]  ;;  %v408_v25 = vpack.c.bf16 %v58_v21, %v51_v20  ;;  %v44_v29 = vld [vmem:[#allocation2 + $0x30] sm:$0xff] }
  0x2e   :  { %p480_p6 = pnand %p479_p5, %p473_p2 }
  0x32   :  { %134 = vmatmul.mubr.f32.vlgmr.msra.gmra.mrb[0].mxu1 %v38_v22 }
  0x33   :  { %274 = vmatmul.mubr.f32.vlgmr.msra.gmra.mrb[0].mxu0 %v42_v24  ;;  %402 = vmatpush1.bf16.xpose.msra.mxu1 %v401_v23 }
  0x34   :  { %410 = vmatpush3.bf16.xpose.msk.msra.mxu0 %vm409_vm1, %v408_v25  ;;  %203 = vmatprep.mubr.f32.mxu1 %v41_v26 }
  0x35   :  { %392 = vmatprep.mubr.msk.f32.mxu0 %vm505_vm2, %v506_v27 }
  0x3a   :  { %204 = vmatmul.mubr.f32.vlgmr.msra.gmra.mrb[0].mxu1 %v40_v28 }
  0x3b   :  { %393 = vmatmul.mubr.msk.f32.vlgmr.msra.gmra.mrb[0].mxu0 %vm59_vm0, %v44_v29 }
 0x10d   :  { %v205_v30 = vpop.f32.mrb[0].mxu1 }
 0x10e   :  { %v345_v31 = vpop.f32.mrb[0].mxu0  ;;  %v207_v32 = vpop.f32.mrb[1].mxu1 }
 0x10f   :  { %v411_v33 = vadd.f32 %v345_v31, %v205_v30  ;;  %v394_v34 = vpop.f32.mrb[1].mxu0 }
 0x111   :  { %v349_v35 = vmul.f32 %v411_v33, %v411_v33 }
 0x113   :  { %v350_v36 = vsel %vm59_vm0, %v349_v35, 0.0 }
 0x114   :  { %351 = vadd.xlane.f32.xlu0 %v350_v36 }
 0x1a1   :  { %v352_v37 = vpop.xlane.xlu0 %351 }
 0x1a2   :  { %v353_v38 = vmul.f32 0.0625, %v352_v37 }
 0x1a4   :  { %424 = vrsqrt.f32 %v353_v38  ;;  %vm356_vm3 = vcmp.eq.f32.partialorder %v353_v38, inf  ;;  %v359_v41 = vand.u32 2147483648, %v353_v38  ;;  %vm358_vm4 = vcmp.eq.f32.partialorder %v353_v38, 0.0 }
 0x1ae   :  { %v425_v39 = vpop.eup %424 }
 0x1af   :  { %v355_v40 = vmul.f32 %v425_v39, %v353_v38 }
 0x1b1   :  { %v357_v42 = vsel %vm356_vm3, %v353_v38, %v355_v40 }
 0x1b2   :  { %v360_v43 = vsel %vm358_vm4, %v359_v41, %v357_v42 }
 0x1b3   :  { %v361_v44 = vadd.f32 1e-08, %v360_v43 }
 0x1b5   :  { %426 = vrcp.f32 %v361_v44 }
 0x1bf   :  { %v427_v45 = vpop.eup %426 }
 0x1c0   :  { %v364_v46 = vmul.f32 %v427_v45, %v411_v33 }
 0x1c2   :  { %365 = vst.msk [vmem:[#allocation7] sm:$0xff] %vm59_vm0, %v364_v46 }
 0x1c3   :  { %483 = shalt.err (!%p480_p6)
}
 0x1c4   :  { %s484_s10 = scalar_lea.hbm %s573_s2, 128 }
 0x1c5   :  { %p485_p7 = scmp.ne.s32.totalorder %s573_s2, %s484_s10  ;;  %p488_p8 = scmp.lt.u32.totalorder %s484_s10, %s573_s2 }
 0x1c7   :  { %p490_p9 = pnand %p488_p8, %p485_p7 }
 0x1c9   :  { %493 = shalt.err (!%p490_p9)
}
 0x1ca   :  { %375 = dma.vmem_to_hbm [thread:$0]  %s373_s6, 128, %s573_s2, [#allocation4]  }
 0x1cb   :  { %498 = dma.done.wait [#allocation4], 128  }
 0x1cc   :  { %499 = vsyncadd [#allocation4], 4294967168 }
 0x1cd   :  { %379 = vsyncpa [#allocation3], 1 }
 0x1ce   :  { %380 = vsyncpa [#allocation6], 1 }
 0x1cf   :  { %381 = vsyncpa [#allocation4], 1 }

</bundles_post_ra>
